<compile_context>
chip_gen: v7x
topology: tpu7x:2x2x1
jax: 0.10.0
libtpu: 0.0.40
codegen_flags: <defaults>
</compile_context>

<pallas_src>
import functools

import jax
import jax.numpy as jnp
from jax.experimental import pallas as pl
from jax.experimental.pallas import tpu as pltpu


def _pooler_kernel(x_ref, w_ref, b_ref, o_ref, acc_ref, *, tk):
    # x_ref:   (tm, Kp)   resident activation slab (first-token rows)
    # w_ref:   (tk, tn)   weight tile (streamed)
    # b_ref:   (1, tn)    bias tile
    # o_ref:   (tm, tn)   output tile
    # acc_ref: (tm, tn)   f32 accumulator (persists across the K axis)
    k = pl.program_id(2)

    @pl.when(k == 0)
    def _():
        # Fold the bias into the accumulator init (single broadcast, no
        # separate epilogue VALU add pass).
        acc_ref[...] = jnp.broadcast_to(
            b_ref[...].astype(jnp.float32), acc_ref.shape
        )

    # Slice the current K chunk out of the resident x slab (128-aligned start).
    x_blk = x_ref[:, pl.ds(pl.multiple_of(k * tk, 128), tk)]
    acc_ref[...] += jnp.dot(
        x_blk, w_ref[...], preferred_element_type=jnp.float32
    )

    @pl.when(k == pl.num_programs(2) - 1)
    def _():
        # tanh in f32 (safe on v5e which lacks a bf16 EUP path), then cast.
        o_ref[...] = jnp.tanh(acc_ref[...]).astype(o_ref.dtype)


def _round_up(a, b):
    return (a + b - 1) // b * b


def _pick_tile(dim, cap):
    """Pick a lane-aligned tile for `dim`.

    Prefers the largest multiple of 128 <= cap that divides `dim` exactly
    (zero padding).  Falls back to padding `dim` up to a multiple of 128 and
    tiling the padded extent.  Returns (tile, padded_dim).
    """
    cap = max(128, (cap // 128) * 128)
    best = 0
    for t in range(128, min(cap, dim) + 1, 128):
        if dim % t == 0:
            best = t
    if best:
        return best, dim
    padded = _round_up(dim, 128)
    best = 128
    for t in range(128, min(cap, padded) + 1, 128):
        if padded % t == 0:
            best = t
    return best, padded


@functools.partial(jax.jit, static_argnames=("tm", "tn", "tk"))
def pooler(hidden_states, weight, bias, *, tm=None, tn=None, tk=None):
    """hidden_states: (B, S, Hin); weight: (Hin, Hout); bias: (Hout,)."""
    B, _, Hin = hidden_states.shape
    Hout = weight.shape[1]
    out_dtype = hidden_states.dtype
    itemsize = jnp.dtype(out_dtype).itemsize
    w_itemsize = jnp.dtype(weight.dtype).itemsize

    # dtype-aware sublane packing (f32: 8 rows/vreg, bf16: 16, int8/fp8: 32).
    sublane = {4: 8, 2: 16, 1: 32}.get(itemsize, 8)

    # ---- tm / Bp: single i tile for realistic pooler batches ---------------
    if tm is None:
        tm = min(_round_up(B, sublane), 256)
        # Keep the resident (tm, Kp) x slab modest (<= ~8 MiB per buffer).
        kp_est = _round_up(max(Hin, 128), 128)
        row_budget = (8 << 20) // max(kp_est * itemsize, 1)
        row_budget = max(sublane, (row_budget // sublane) * sublane)
        tm = max(sublane, min(tm, row_budget))
    else:
        tm = max(sublane, _round_up(tm, sublane))
    Bp = _round_up(B, tm)
    multi_i = (Bp // tm) > 1

    # ---- tk / Kp: prefer exact divisors of Hin (no weight pad-copy) --------
    if tk is None:
        tk, Kp = _pick_tile(Hin, 1024)
    else:
        tk = _round_up(tk, 128)
        Kp = _round_up(Hin, tk)

    # ---- tn / Np: exact divisors of Hout; >= 2 j blocks for v7x dual-TC ----
    if tn is None:
        tn_cap = 1024
        if (not multi_i) and Hout >= 256:
            tn_cap = min(tn_cap, _round_up(Hout, 128) // 2)
        tn, Np = _pick_tile(Hout, tn_cap)
    else:
        tn = _round_up(tn, 128)
        Np = _round_up(Hout, tn)

    # ---- wrapper-side data prep --------------------------------------------
    # Squeeze the seq dim: kernel gets a clean (B, Hin) slab.
    # TODO(synk): the CLS gather could be fused via a Squeezed seq BlockSpec,
    # but the wrapper slice is tiny relative to the weight stream.
    x = hidden_states[:, 0, :]
    if (Bp, Kp) != (B, Hin):
        x = jnp.pad(x, ((0, Bp - B), (0, Kp - Hin)))
    w = weight
    if (Kp, Np) != (Hin, Hout):
        # Rare fallback: only hit when Hin/Hout are not multiples of 128 (or
        # user-supplied tiles don't divide them).  Zero padding keeps the
        # K-accumulation exact; extra N columns are sliced away below.
        w = jnp.pad(w, ((0, Kp - Hin), (0, Np - Hout)))
    b2 = bias.reshape(1, Hout)
    if Np != Hout:
        b2 = jnp.pad(b2, ((0, 0), (0, Np - Hout)))

    grid = (Bp // tm, Np // tn, Kp // tk)

    # ---- explicit VMEM budget (resident x slab + double-buffered streams) --
    vmem_need = (
        2 * itemsize * tm * Kp        # resident x slab (pipeliner buffers x2)
        + 2 * w_itemsize * tk * tn    # weight tiles (double-buffered)
        + 2 * itemsize * tn           # bias tile
        + 2 * itemsize * tm * tn      # pipelined output
        + 4 * tm * tn                 # f32 accumulator scratch
    )
    vmem_limit = int(min(vmem_need + (8 << 20), 56 << 20))
    vmem_limit = max(vmem_limit, vmem_need + (1 << 20))

    cost = pl.CostEstimate(
        flops=2 * B * Hin * Hout,
        transcendentals=B * Hout,
        bytes_accessed=(
            Hin * Hout * w_itemsize
            + B * Hin * itemsize
            + B * Hout * itemsize
            + Hout * jnp.dtype(bias.dtype).itemsize
        ),
    )

    out_padded = pl.pallas_call(
        functools.partial(_pooler_kernel, tk=tk),
        out_shape=jax.ShapeDtypeStruct((Bp, Np), out_dtype),
        grid_spec=pltpu.PrefetchScalarGridSpec(
            num_scalar_prefetch=0,
            grid=grid,
            in_specs=[
                # x: resident per i-tile; never re-DMAed across (j, k).
                pl.BlockSpec((tm, Kp), lambda i, j, k: (i, 0)),
                # weight: streamed once per (k, j) tile.
                pl.BlockSpec((tk, tn), lambda i, j, k: (k, j)),
                # bias: tiny, per-j tile.
                pl.BlockSpec((1, tn), lambda i, j, k: (0, j)),
            ],
            out_specs=pl.BlockSpec((tm, tn), lambda i, j, k: (i, j)),
            scratch_shapes=[pltpu.VMEM((tm, tn), jnp.float32)],
        ),
        compiler_params=pltpu.CompilerParams(
            dimension_semantics=("parallel", "parallel", "arbitrary"),
            vmem_limit_bytes=vmem_limit,
        ),
        cost_estimate=cost,
    )(x, w, b2)

    return out_padded[:B, :Hout]


def pooler_ref(hidden_states, weight, bias):
    first = hidden_states[:, 0]
    return jnp.tanh(first @ weight + bias)


if __name__ == "__main__":
    key = jax.random.PRNGKey(0)

    # --- case 1: small shapes matching the module/test harness -------------
    k1, k2, k3, key = jax.random.split(key, 4)
    B, S, Hin, Hout = 2, 8, 32, 32
    hs = jax.random.normal(k1, (B, S, Hin), dtype=jnp.float32)
    w = jax.random.normal(k2, (Hin, Hout), dtype=jnp.float32) / jnp.sqrt(Hin)
    b = jax.random.normal(k3, (Hout,), dtype=jnp.float32) * 0.01

    out = jax.block_until_ready(pooler(hs, w, b))
    ref = pooler_ref(hs, w, b)
    assert out.shape == (B, Hout)
    assert jnp.allclose(out, ref, atol=1e-5, rtol=1e-5)

    # --- case 2: 128-multiple Hin (no weight pad) + unaligned Hout ----------
    k1, k2, k3, key = jax.random.split(key, 4)
    B2, S2, Hin2, Hout2 = 3, 5, 640, 200
    hs2 = jax.random.normal(k1, (B2, S2, Hin2), dtype=jnp.float32)
    w2 = jax.random.normal(k2, (Hin2, Hout2), dtype=jnp.float32) / jnp.sqrt(Hin2)
    b2 = jax.random.normal(k3, (Hout2,), dtype=jnp.float32) * 0.01

    out2 = jax.block_until_ready(pooler(hs2, w2, b2))
    ref2 = pooler_ref(hs2, w2, b2)
    assert out2.shape == (B2, Hout2)
    assert jnp.allclose(out2, ref2, atol=1e-4, rtol=1e-4)

    # Same shapes with a forced small tk to exercise the K-accumulation loop
    # and the in-kernel pl.ds slice of the resident x slab.
    out2b = jax.block_until_ready(pooler(hs2, w2, b2, tk=256))
    assert jnp.allclose(out2b, ref2, atol=1e-4, rtol=1e-4)

    # --- case 3: BERT-base-like sizes; divisor tiles, 2 parallel j blocks ---
    k1, k2, k3, key = jax.random.split(key, 4)
    B3, S3, Hin3, Hout3 = 4, 3, 768, 768
    hs3 = jax.random.normal(k1, (B3, S3, Hin3), dtype=jnp.float32)
    w3 = jax.random.normal(k2, (Hin3, Hout3), dtype=jnp.float32) / jnp.sqrt(Hin3)
    b3 = jax.random.normal(k3, (Hout3,), dtype=jnp.float32) * 0.01

    out3 = jax.block_until_ready(pooler(hs3, w3, b3))
    ref3 = pooler_ref(hs3, w3, b3)
    assert out3.shape == (B3, Hout3)
    assert jnp.allclose(out3, ref3, atol=1e-4, rtol=1e-4)

    print("KERNEL_OK")
</pallas_src>

<mosaic_0001>
module attributes {stable_mosaic.version = 11 : i64} {
  func.func @_pooler_kernel(%arg0: i32, %arg1: i32, %arg2: i32, %arg3: memref<8x128xf32, #tpu.memory_space<vmem>>, %arg4: memref<128x128xf32, #tpu.memory_space<vmem>>, %arg5: memref<1x128xf32, #tpu.memory_space<vmem>>, %arg6: memref<8x128xf32, #tpu.memory_space<vmem>>, %arg7: memref<8x128xf32, #tpu.memory_space<vmem>>) attributes {dimension_semantics = [#tpu.dimension_semantics<parallel>, #tpu.dimension_semantics<parallel>, #tpu.dimension_semantics<arbitrary>], iteration_bounds = array<i64: 1, 1, 1>, scalar_prefetch = 0 : i64, scratch_operands = 1 : i64, tpu.core_type = #tpu.core_type<tc>, window_params = [{transform_indices = @transform_0, window_bounds = array<i64: 8, 128>}, {transform_indices = @transform_1, window_bounds = array<i64: 128, 128>}, {transform_indices = @transform_2, window_bounds = array<i64: 1, 128>}, {transform_indices = @transform_3, window_bounds = array<i64: 8, 128>}]} {
    %c0_i32 = arith.constant 0 : i32
    %0 = arith.cmpi eq, %arg2, %c0_i32 : i32
    %1 = arith.extui %0 : i1 to i32
    %c0_i32_0 = arith.constant 0 : i32
    %2 = arith.cmpi ne, %1, %c0_i32_0 : i32
    scf.if %2 {
      %c0_9 = arith.constant 0 : index
      %c0_10 = arith.constant 0 : index
      %15 = vector.load %arg5[%c0_9, %c0_10] : memref<1x128xf32, #tpu.memory_space<vmem>>, vector<1x128xf32>
      %16 = vector.shape_cast %15 : vector<1x128xf32> to vector<1x128xf32>
      %17 = vector.broadcast %16 : vector<1x128xf32> to vector<8x128xf32>
      %c0_11 = arith.constant 0 : index
      %c0_12 = arith.constant 0 : index
      %18 = vector.load %arg7[%c0_11, %c0_12] : memref<8x128xf32, #tpu.memory_space<vmem>>, vector<8x128xf32>
      tpu.vector_store %arg7[%c0_11, %c0_12], %17 {strides = array<i32>} : memref<8x128xf32, #tpu.memory_space<vmem>>, vector<8x128xf32>,
    } else {
    }
    %c128_i32 = arith.constant 128 : i32
    %3 = arith.muli %arg2, %c128_i32 : i32
    %4 = tpu.assume_multiple %3, 128 : i32
    %c0 = arith.constant 0 : index
    %5 = arith.index_cast %4 : i32 to index
    %6 = vector.load %arg3[%c0, %5] : memref<8x128xf32, #tpu.memory_space<vmem>>, vector<8x128xf32>
    %c0_1 = arith.constant 0 : index
    %c0_2 = arith.constant 0 : index
    %7 = vector.load %arg7[%c0_1, %c0_2] : memref<8x128xf32, #tpu.memory_space<vmem>>, vector<8x128xf32>
    %c0_3 = arith.constant 0 : index
    %c0_4 = arith.constant 0 : index
    %8 = vector.load %arg4[%c0_3, %c0_4] : memref<128x128xf32, #tpu.memory_space<vmem>>, vector<128x128xf32>
    %cst = arith.constant dense<0.000000e+00> : vector<8x128xf32>
    %9 = tpu.matmul %6, %8, %cst {dimension_numbers = #tpu.dot_dimension_numbers<[1], [0], [0], [1], [0, 0, 1, 1], [], []>} : vector<8x128xf32>, vector<128x128xf32>, vector<8x128xf32> -> vector<8x128xf32>
    %10 = arith.addf %7, %9 : vector<8x128xf32>
    %c0_5 = arith.constant 0 : index
    %c0_6 = arith.constant 0 : index
    %11 = vector.load %arg7[%c0_5, %c0_6] : memref<8x128xf32, #tpu.memory_space<vmem>>, vector<8x128xf32>
    tpu.vector_store %arg7[%c0_5, %c0_6], %10 {strides = array<i32>} : memref<8x128xf32, #tpu.memory_space<vmem>>, vector<8x128xf32>,
    %c0_i32_7 = arith.constant 0 : i32
    %12 = arith.cmpi eq, %arg2, %c0_i32_7 : i32
    %13 = arith.extui %12 : i1 to i32
    %c0_i32_8 = arith.constant 0 : i32
    %14 = arith.cmpi ne, %13, %c0_i32_8 : i32
    scf.if %14 {
      %c0_9 = arith.constant 0 : index
      %c0_10 = arith.constant 0 : index
      %15 = vector.load %arg7[%c0_9, %c0_10] : memref<8x128xf32, #tpu.memory_space<vmem>>, vector<8x128xf32>
      %16 = math.tanh %15 : vector<8x128xf32>
      %c0_11 = arith.constant 0 : index
      %c0_12 = arith.constant 0 : index
      %17 = vector.load %arg6[%c0_11, %c0_12] : memref<8x128xf32, #tpu.memory_space<vmem>>, vector<8x128xf32>
      tpu.vector_store %arg6[%c0_11, %c0_12], %16 {strides = array<i32>} : memref<8x128xf32, #tpu.memory_space<vmem>>, vector<8x128xf32>,
    } else {
    }
    return
  }
  func.func @transform_0(%arg0: i32, %arg1: i32, %arg2: i32) -> (i32, i32) {
    %c0_i32 = arith.constant 0 : i32
    %c0_i32_0 = arith.constant 0 : i32
    return %arg0, %c0_i32 : i32, i32
  }
  func.func @transform_1(%arg0: i32, %arg1: i32, %arg2: i32) -> (i32, i32) {
    %c0_i32 = arith.constant 0 : i32
    return %arg2, %arg1 : i32, i32
  }
  func.func @transform_2(%arg0: i32, %arg1: i32, %arg2: i32) -> (i32, i32) {
    %c0_i32 = arith.constant 0 : i32
    %c0_i32_0 = arith.constant 0 : i32
    return %c0_i32, %arg1 : i32, i32
  }
  func.func @transform_3(%arg0: i32, %arg1: i32, %arg2: i32) -> (i32, i32) {
    %c0_i32 = arith.constant 0 : i32
    return %arg0, %arg1 : i32, i32
  }
}

</mosaic_0001>

<bundles_post_ra>
// kernel: pooler.1
= control target key start
LH: loop header
LB: loop body
LE: loop exit
PB: predicated region body
PF: predicated region fallthrough
CT: control target
= control target key end

     0   :  { %v213_v0 = vmov 0.0|0.0   ;;  %vm214_vm0 = vmmov 0   ;;  %v215_v4 = vmov 0.0   ;;  %s293_s1 = inlined_call_operand.vmem [shape: f32[128,128], index: 1, kind: input, shape index: {}]   ;;  %s294_s0 = inlined_call_operand.vmem [shape: f32[8,128], index: 0, kind: input, shape index: {}]   ;;  %s295_s2 = inlined_call_operand.vmem [shape: f32[1,128], index: 2, kind: input, shape index: {}]   ;;  %s296_s3 = inlined_call_operand.vmem [shape: f32[8,128], index: 3, kind: output, shape index: {}]  }
   0x1   :  { %184 = vmatprep.subr.bf16.mxu0 %v213_v0  ;;  %v32_v1 = vld [vmem:[%s293_s1] sm:$0xff]  ;;  %v33_v2 = vld [vmem:[%s293_s1 + $0x8] sm:$0xff]  ;;  %v34_v3 = vld [vmem:[%s293_s1 + $0x10] sm:$0xff]  ;;  %181 = vmatprep.mubr.msk.f32.mxu0 %vm214_vm0, %v215_v4 }
   0x2   :  { %v185_v5 = vpack.c.bf16 %v33_v2, %v32_v1  ;;  %v35_v6 = vld [vmem:[%s293_s1 + $0x18] sm:$0xff]  ;;  %v36_v8 = vld [vmem:[%s293_s1 + $0x20] sm:$0xff]  ;;  %v37_v9 = vld [vmem:[%s293_s1 + $0x28] sm:$0xff] }
   0x3   :  { %v188_v7 = vpack.c.bf16 %v35_v6, %v34_v3  ;;  %v191_v10 = vpack.c.bf16 %v37_v9, %v36_v8  ;;  %v38_v11 = vld [vmem:[%s293_s1 + $0x30] sm:$0xff]  ;;  %v39_v12 = vld [vmem:[%s293_s1 + $0x38] sm:$0xff]  ;;  %v40_v14 = vld [vmem:[%s293_s1 + $0x40] sm:$0xff] }
   0x4   :  { %186 = vmatpush3.bf16.msra.mxu0 %v185_v5  ;;  %v194_v13 = vpack.c.bf16 %v39_v12, %v38_v11  ;;  %v41_v15 = vld [vmem:[%s293_s1 + $0x48] sm:$0xff]  ;;  %v42_v17 = vld [vmem:[%s293_s1 + $0x50] sm:$0xff]  ;;  %v43_v18 = vld [vmem:[%s293_s1 + $0x58] sm:$0xff] }
   0x5   :  { %187 = vmatprep.subr.bf16.mxu0 %v213_v0  ;;  %v197_v16 = vpack.c.bf16 %v41_v15, %v40_v14  ;;  %v200_v19 = vpack.c.bf16 %v43_v18, %v42_v17  ;;  %v44_v20 = vld [vmem:[%s293_s1 + $0x60] sm:$0xff]  ;;  %v45_v21 = vld [vmem:[%s293_s1 + $0x68] sm:$0xff]  ;;  %v46_v23 = vld [vmem:[%s293_s1 + $0x70] sm:$0xff] }
   0x6   :  { %v203_v22 = vpack.c.bf16 %v45_v21, %v44_v20  ;;  %v47_v24 = vld [vmem:[%s293_s1 + $0x78] sm:$0xff]  ;;  %v30_v26 = vld [vmem:[%s294_s0] sm:$0xff] }
   0x7   :  { %v206_v25 = vpack.c.bf16 %v47_v24, %v46_v23  ;;  %v131_v27 = vld [vmem:[%s295_s2] ss:$0 sm:$0xff] }
   0x8   :  { %189 = vmatpush3.bf16.msra.mxu0 %v188_v7 }
   0x9   :  { %190 = vmatprep.subr.bf16.mxu0 %v213_v0 }
   0xc   :  { %192 = vmatpush3.bf16.msra.mxu0 %v191_v10 }
   0xd   :  { %193 = vmatprep.subr.bf16.mxu0 %v213_v0 }
  0x10   :  { %195 = vmatpush3.bf16.msra.mxu0 %v194_v13 }
  0x11   :  { %196 = vmatprep.subr.bf16.mxu0 %v213_v0 }
  0x14   :  { %198 = vmatpush3.bf16.msra.mxu0 %v197_v16 }
  0x15   :  { %199 = vmatprep.subr.bf16.mxu0 %v213_v0 }
  0x18   :  { %201 = vmatpush3.bf16.msra.mxu0 %v200_v19 }
  0x19   :  { %202 = vmatprep.subr.bf16.mxu0 %v213_v0 }
  0x1c   :  { %204 = vmatpush3.bf16.msra.mxu0 %v203_v22 }
  0x1d   :  { %205 = vmatprep.subr.bf16.mxu0 %v213_v0 }
  0x20   :  { %207 = vmatpush3.bf16.msra.mxu0 %v206_v25 }
  0x23   :  { %182 = vmatmul.mubr.f32.vlgmr.msra.gmra.mrb[0].mxu0 %v30_v26 }
  0xf6   :  { %v114_v28 = vpop.f32.mrb[0].mxu0 }
  0xf7   :  { %v118_v29 = vadd.f32 %v131_v27, %v114_v28  ;;  %v183_v30 = vpop.f32.mrb[1].mxu0 }
  0xf9   :  { %211 = vtanh.f32 %v118_v29 }
 0x103   :  { %v212_v31 = vpop.eup %211 }
 0x104   :  { %125 = vst [vmem:[%s296_s3] sm:$0xff] %v212_v31 }

</bundles_post_ra>
